<compile_context>
chip_gen: v7x
topology: tpu7x:2x2x1
jax: 0.10.0
libtpu: 0.0.40
codegen_flags: <defaults>
</compile_context>

<pallas_src>
import functools

import jax
import jax.numpy as jnp
from jax.experimental import pallas as pl
from jax.experimental.pallas import tpu as pltpu

IN_DIM = 256
HID_DIM = 128
OUT_DIM = 64
OUT_PAD = 128  # lane-dense output width; extra columns are zero and sliced off in the wrapper


def _round_up(x, m):
    return ((x + m - 1) // m) * m


def _mlp_kernel(x_ref, w1_ref, b1_ref, w2_ref, b2_ref, o_ref):
    # Fused hot path: matmul -> bias -> ReLU -> matmul -> bias, all in VMEM.
    # Matmuls run on the MXU with f32 accumulation; bias + ReLU run in f32 on the VPU.
    h = jnp.dot(x_ref[...], w1_ref[...], preferred_element_type=jnp.float32)   # (bm, 128) f32
    h = jnp.maximum(h + b1_ref[...], 0.0)                                      # bias + ReLU in f32
    y = jnp.dot(h.astype(w2_ref.dtype), w2_ref[...],
                preferred_element_type=jnp.float32)                            # (bm, 128) f32
    o_ref[...] = (y + b2_ref[...]).astype(o_ref.dtype)                         # full 128-lane store


@functools.partial(jax.jit, static_argnames=("block_m", "use_bf16"))
def projection_model_forward(res, w1, b1, w2, b2, *, block_m=1024, use_bf16=True):
    """res: (B, 256).  w1: (256, 128), b1: (1, 128), w2: (128, 64), b2: (1, 64).

    Returns (B, 64) in res.dtype. `use_bf16=True` casts matmul inputs to bf16
    (native MXU dtype on v5e/v6e/v7x) while keeping f32 accumulation / bias / ReLU.
    """
    B = res.shape[0]
    out_dtype = res.dtype

    # ---- lane-dense second layer: pad out-dim 64 -> 128 with zero columns ----
    b1f = b1.reshape(1, HID_DIM).astype(jnp.float32)
    w2p = jnp.pad(w2.reshape(HID_DIM, OUT_DIM), ((0, 0), (0, OUT_PAD - OUT_DIM)))
    b2p = jnp.pad(b2.reshape(1, OUT_DIM).astype(jnp.float32),
                  ((0, 0), (0, OUT_PAD - OUT_DIM)))

    # ---- matmul operand dtype ----
    mm_dtype = jnp.bfloat16 if use_bf16 else res.dtype
    x = res.astype(mm_dtype)
    w1c = w1.astype(mm_dtype)
    w2c = w2p.astype(mm_dtype)

    # ---- batch tiling: big tiles (fill MXU, amortize step overhead), pad ragged batch ----
    bm = min(block_m, _round_up(B, 8))          # small batches collapse to one full tile
    B_pad = _round_up(B, bm)
    if B_pad != B:
        x = jnp.pad(x, ((0, B_pad - B), (0, 0)))
    grid = (B_pad // bm,)
    # Note (v7x): with 2 TensorCores/chip, a grid >= 2 steps lets "parallel" shard across cores.
    # VMEM use at bm=1024 (bf16 x): ~1 MiB x-bufs + 1 MiB out-bufs + <0.2 MiB weights — fits
    # comfortably inside every chip's default scoped VMEM (16/32/32 MiB on v5e/v6e/v7x).

    bytes_accessed = (
        x.size * x.dtype.itemsize
        + w1c.size * w1c.dtype.itemsize
        + w2c.size * w2c.dtype.itemsize
        + b1f.size * b1f.dtype.itemsize
        + b2p.size * b2p.dtype.itemsize
        + B_pad * OUT_PAD * jnp.dtype(out_dtype).itemsize
    )
    cost = pl.CostEstimate(
        flops=2 * B_pad * (IN_DIM * HID_DIM + HID_DIM * OUT_PAD),
        transcendentals=0,
        bytes_accessed=bytes_accessed,
    )

    out_padded = pl.pallas_call(
        _mlp_kernel,
        out_shape=jax.ShapeDtypeStruct((B_pad, OUT_PAD), out_dtype),
        grid_spec=pl.GridSpec(
            grid=grid,
            in_specs=[
                pl.BlockSpec((bm, IN_DIM), lambda i: (i, 0)),        # x tile (pipelined per step)
                pl.BlockSpec((IN_DIM, HID_DIM), lambda i: (0, 0)),   # W1 (grid-invariant)
                pl.BlockSpec((1, HID_DIM), lambda i: (0, 0)),        # b1 (grid-invariant)
                pl.BlockSpec((HID_DIM, OUT_PAD), lambda i: (0, 0)),  # W2 padded (grid-invariant)
                pl.BlockSpec((1, OUT_PAD), lambda i: (0, 0)),        # b2 padded (grid-invariant)
            ],
            out_specs=pl.BlockSpec((bm, OUT_PAD), lambda i: (i, 0)),
        ),
        compiler_params=pltpu.CompilerParams(
            dimension_semantics=("parallel",),
        ),
        cost_estimate=cost,
    )(x, w1c, b1f, w2c, b2p)

    return out_padded[:B, :OUT_DIM]


def init_params(key):
    """Deterministic init mimicking nn.Linear default (uniform +-1/sqrt(fan_in))."""
    k1, k2, k3, k4 = jax.random.split(key, 4)
    bound1 = 1.0 / jnp.sqrt(IN_DIM)
    bound2 = 1.0 / jnp.sqrt(HID_DIM)
    # stored as (in, out) = transpose of PyTorch's (out, in)
    w1 = jax.random.uniform(k1, (IN_DIM, HID_DIM), jnp.float32, -bound1, bound1)
    b1 = jax.random.uniform(k2, (1, HID_DIM), jnp.float32, -bound1, bound1)
    w2 = jax.random.uniform(k3, (HID_DIM, OUT_DIM), jnp.float32, -bound2, bound2)
    b2 = jax.random.uniform(k4, (1, OUT_DIM), jnp.float32, -bound2, bound2)
    return w1, b1, w2, b2


if __name__ == "__main__":
    key = jax.random.PRNGKey(0)
    k_x, k_p = jax.random.split(key)

    batch = 8  # small test shape; real workloads should use batch >> block_m for full tiles
    res = jax.random.normal(k_x, (batch, IN_DIM), jnp.float32)
    w1, b1, w2, b2 = init_params(k_p)

    # pure-JAX reference
    ref = jnp.maximum(res @ w1 + b1, 0.0) @ w2 + b2

    # f32 path (tight tolerance)
    out_f32 = jax.block_until_ready(
        projection_model_forward(res, w1, b1, w2, b2, use_bf16=False))
    assert out_f32.shape == (batch, OUT_DIM)
    assert jnp.allclose(out_f32, ref, atol=1e-5, rtol=1e-5)

    # default bf16-matmul path (f32 accumulate / bias / ReLU) -> loosened tolerance
    out_bf16 = jax.block_until_ready(projection_model_forward(res, w1, b1, w2, b2))
    assert out_bf16.shape == (batch, OUT_DIM)
    assert jnp.allclose(out_bf16, ref, atol=5e-2, rtol=5e-2)

    # ragged batch (exercises the padding path; no divisibility requirement)
    res_odd = res[:5]
    out_odd = jax.block_until_ready(projection_model_forward(res_odd, w1, b1, w2, b2))
    assert out_odd.shape == (5, OUT_DIM)
    assert jnp.allclose(out_odd, ref[:5], atol=5e-2, rtol=5e-2)

    print("KERNEL_OK")
</pallas_src>

<mosaic_0001>
module attributes {stable_mosaic.version = 11 : i64} {
  func.func @_mlp_kernel(%arg0: i32, %arg1: memref<8x256xf32, #tpu.memory_space<vmem>>, %arg2: memref<256x128xf32, #tpu.memory_space<vmem>>, %arg3: memref<1x128xf32, #tpu.memory_space<vmem>>, %arg4: memref<128x128xf32, #tpu.memory_space<vmem>>, %arg5: memref<1x128xf32, #tpu.memory_space<vmem>>, %arg6: memref<8x128xf32, #tpu.memory_space<vmem>>) attributes {dimension_semantics = [#tpu.dimension_semantics<parallel>], iteration_bounds = array<i64: 1>, scalar_prefetch = 0 : i64, scratch_operands = 0 : i64, tpu.core_type = #tpu.core_type<tc>, window_params = [{transform_indices = @transform_0, window_bounds = array<i64: 8, 256>}, {pipeline_mode = #tpu.pipeline_mode<synchronous>, transform_indices = @transform_1, window_bounds = array<i64: 256, 128>}, {pipeline_mode = #tpu.pipeline_mode<synchronous>, transform_indices = @transform_2, window_bounds = array<i64: 1, 128>}, {pipeline_mode = #tpu.pipeline_mode<synchronous>, transform_indices = @transform_3, window_bounds = array<i64: 128, 128>}, {pipeline_mode = #tpu.pipeline_mode<synchronous>, transform_indices = @transform_4, window_bounds = array<i64: 1, 128>}, {transform_indices = @transform_5, window_bounds = array<i64: 8, 128>}]} {
    %c0 = arith.constant 0 : index
    %c0_0 = arith.constant 0 : index
    %0 = vector.load %arg1[%c0, %c0_0] : memref<8x256xf32, #tpu.memory_space<vmem>>, vector<8x256xf32>
    %c0_1 = arith.constant 0 : index
    %c0_2 = arith.constant 0 : index
    %1 = vector.load %arg2[%c0_1, %c0_2] : memref<256x128xf32, #tpu.memory_space<vmem>>, vector<256x128xf32>
    %cst = arith.constant dense<0.000000e+00> : vector<8x128xf32>
    %2 = tpu.matmul %0, %1, %cst {dimension_numbers = #tpu.dot_dimension_numbers<[1], [0], [0], [1], [0, 0, 1, 1], [], []>} : vector<8x256xf32>, vector<256x128xf32>, vector<8x128xf32> -> vector<8x128xf32>
    %c0_3 = arith.constant 0 : index
    %c0_4 = arith.constant 0 : index
    %3 = vector.load %arg3[%c0_3, %c0_4] : memref<1x128xf32, #tpu.memory_space<vmem>>, vector<1x128xf32>
    %4 = vector.broadcast %3 : vector<1x128xf32> to vector<8x128xf32>
    %5 = arith.addf %2, %4 : vector<8x128xf32>
    %cst_5 = arith.constant 0.000000e+00 : f32
    %6 = vector.broadcast %cst_5 : f32 to vector<8x128xf32>
    %7 = arith.maximumf %5, %6 : vector<8x128xf32>
    %c0_6 = arith.constant 0 : index
    %c0_7 = arith.constant 0 : index
    %8 = vector.load %arg4[%c0_6, %c0_7] : memref<128x128xf32, #tpu.memory_space<vmem>>, vector<128x128xf32>
    %cst_8 = arith.constant dense<0.000000e+00> : vector<8x128xf32>
    %9 = tpu.matmul %7, %8, %cst_8 {dimension_numbers = #tpu.dot_dimension_numbers<[1], [0], [0], [1], [0, 0, 1, 1], [], []>} : vector<8x128xf32>, vector<128x128xf32>, vector<8x128xf32> -> vector<8x128xf32>
    %c0_9 = arith.constant 0 : index
    %c0_10 = arith.constant 0 : index
    %10 = vector.load %arg5[%c0_9, %c0_10] : memref<1x128xf32, #tpu.memory_space<vmem>>, vector<1x128xf32>
    %11 = vector.broadcast %10 : vector<1x128xf32> to vector<8x128xf32>
    %12 = arith.addf %9, %11 : vector<8x128xf32>
    %c0_11 = arith.constant 0 : index
    %c0_12 = arith.constant 0 : index
    %13 = vector.load %arg6[%c0_11, %c0_12] : memref<8x128xf32, #tpu.memory_space<vmem>>, vector<8x128xf32>
    tpu.vector_store %arg6[%c0_11, %c0_12], %12 {strides = array<i32>} : memref<8x128xf32, #tpu.memory_space<vmem>>, vector<8x128xf32>,
    return
  }
  func.func @transform_0(%arg0: i32) -> (i32, i32) {
    %c0_i32 = arith.constant 0 : i32
    %c0_i32_0 = arith.constant 0 : i32
    return %arg0, %c0_i32 : i32, i32
  }
  func.func @transform_1(%arg0: i32) -> (i32, i32) {
    %c0_i32 = arith.constant 0 : i32
    %c0_i32_0 = arith.constant 0 : i32
    %c0_i32_1 = arith.constant 0 : i32
    return %c0_i32, %c0_i32_0 : i32, i32
  }
  func.func @transform_2(%arg0: i32) -> (i32, i32) {
    %c0_i32 = arith.constant 0 : i32
    %c0_i32_0 = arith.constant 0 : i32
    %c0_i32_1 = arith.constant 0 : i32
    return %c0_i32, %c0_i32_0 : i32, i32
  }
  func.func @transform_3(%arg0: i32) -> (i32, i32) {
    %c0_i32 = arith.constant 0 : i32
    %c0_i32_0 = arith.constant 0 : i32
    %c0_i32_1 = arith.constant 0 : i32
    return %c0_i32, %c0_i32_0 : i32, i32
  }
  func.func @transform_4(%arg0: i32) -> (i32, i32) {
    %c0_i32 = arith.constant 0 : i32
    %c0_i32_0 = arith.constant 0 : i32
    %c0_i32_1 = arith.constant 0 : i32
    return %c0_i32, %c0_i32_0 : i32, i32
  }
  func.func @transform_5(%arg0: i32) -> (i32, i32) {
    %c0_i32 = arith.constant 0 : i32
    %c0_i32_0 = arith.constant 0 : i32
    return %arg0, %c0_i32 : i32, i32
  }
}

</mosaic_0001>

<bundles_post_ra>
// kernel: projection_model_forward.1
= control target key start
LH: loop header
LB: loop body
LE: loop exit
PB: predicated region body
PF: predicated region fallthrough
CT: control target
= control target key end

     0   :  { %v414_v7 = vmov 0.0|0.0   ;;  %s624_s0 = inlined_call_operand.vmem [shape: f32[8,256], index: 0, kind: input, shape index: {}]   ;;  %s625_s1 = inlined_call_operand.vmem [shape: f32[256,128], index: 1, kind: input, shape index: {}]   ;;  %s626_s2 = inlined_call_operand.vmem [shape: f32[1,128], index: 2, kind: input, shape index: {}]   ;;  %s627_s3 = inlined_call_operand.vmem [shape: f32[128,128], index: 3, kind: input, shape index: {}]   ;;  %s628_s4 = inlined_call_operand.vmem [shape: f32[1,128], index: 4, kind: input, shape index: {}]   ;;  %s629_s5 = inlined_call_operand.hbm [shape: f32[8,128], index: 5, kind: output, shape index: {}]  }
   0x1   :  { %v39_v0 = vld [vmem:[%s625_s1 + $0x80] sm:$0xff]  ;;  %v40_v1 = vld [vmem:[%s625_s1 + $0x88] sm:$0xff]  ;;  %v41_v5 = vld [vmem:[%s625_s1 + $0x90] sm:$0xff]  ;;  %362 = vmatprep.subr.bf16.mxu1 %v414_v7 }
   0x2   :  { %v23_v2 = vld [vmem:[%s625_s1] sm:$0xff]  ;;  %v330_v3 = vpack.c.bf16 %v40_v1, %v39_v0  ;;  %v24_v4 = vld [vmem:[%s625_s1 + $0x8] sm:$0xff]  ;;  %v42_v6 = vld [vmem:[%s625_s1 + $0x98] sm:$0xff] }
   0x3   :  { %v332_v8 = vpack.c.bf16 %v24_v4, %v23_v2  ;;  %v334_v9 = vpack.c.bf16 %v42_v6, %v41_v5  ;;  %v25_v10 = vld [vmem:[%s625_s1 + $0x10] sm:$0xff]  ;;  %v26_v11 = vld [vmem:[%s625_s1 + $0x18] sm:$0xff]  ;;  %v43_v12 = vld [vmem:[%s625_s1 + $0xa0] sm:$0xff] }
   0x4   :  { %331 = vmatprep.subr.bf16.mxu0 %v330_v3  ;;  %v44_v13 = vld [vmem:[%s625_s1 + $0xa8] sm:$0xff]  ;;  %v336_v14 = vpack.c.bf16 %v26_v11, %v25_v10  ;;  %v27_v16 = vld [vmem:[%s625_s1 + $0x20] sm:$0xff]  ;;  %v45_v18 = vld [vmem:[%s625_s1 + $0xb0] sm:$0xff] }
   0x5   :  { %333 = vmatpush3.bf16.msra.mxu0 %v332_v8  ;;  %v338_v15 = vpack.c.bf16 %v44_v13, %v43_v12  ;;  %v28_v17 = vld [vmem:[%s625_s1 + $0x28] sm:$0xff]  ;;  %v46_v19 = vld [vmem:[%s625_s1 + $0xb8] sm:$0xff]  ;;  %v29_v22 = vld [vmem:[%s625_s1 + $0x30] sm:$0xff] }
   0x6   :  { %335 = vmatprep.subr.bf16.mxu0 %v334_v9  ;;  %v340_v20 = vpack.c.bf16 %v28_v17, %v27_v16  ;;  %v342_v21 = vpack.c.bf16 %v46_v19, %v45_v18  ;;  %v30_v23 = vld [vmem:[%s625_s1 + $0x38] sm:$0xff]  ;;  %v47_v24 = vld [vmem:[%s625_s1 + $0xc0] sm:$0xff]  ;;  %v48_v25 = vld [vmem:[%s625_s1 + $0xc8] sm:$0xff] }
   0x7   :  { %v22_v26 = vld [vmem:[%s624_s0 + $0x8] sm:$0xff]  ;;  %v133_v27 = vld [vmem:[%s627_s3] sm:$0xff]  ;;  %v344_v29 = vpack.c.bf16 %v30_v23, %v29_v22  ;;  %v135_v31 = vld [vmem:[%s627_s3 + $0x10] sm:$0xff]  ;;  %v346_v33 = vpack.c.bf16 %v48_v25, %v47_v24 }
   0x8   :  { %126 = vmatprep.mubr.f32.mxu0 %v22_v26  ;;  %v134_v28 = vld [vmem:[%s627_s3 + $0x8] sm:$0xff]  ;;  %v136_v32 = vld [vmem:[%s627_s3 + $0x18] sm:$0xff]  ;;  %v31_v34 = vld [vmem:[%s625_s1 + $0x40] sm:$0xff] }
   0x9   :  { %337 = vmatpush3.bf16.msra.mxu0 %v336_v14  ;;  %v363_v30 = vpack.c.bf16 %v134_v28, %v133_v27  ;;  %v32_v35 = vld [vmem:[%s625_s1 + $0x48] sm:$0xff]  ;;  %v49_v36 = vld [vmem:[%s625_s1 + $0xd0] sm:$0xff]  ;;  %v50_v37 = vld [vmem:[%s625_s1 + $0xd8] sm:$0xff]  ;;  %v366_v38 = vpack.c.bf16 %v136_v32, %v135_v31 }
   0xa   :  { %339 = vmatprep.subr.bf16.mxu0 %v338_v15  ;;  %v137_v39 = vld [vmem:[%s627_s3 + $0x20] sm:$0xff]  ;;  %v138_v40 = vld [vmem:[%s627_s3 + $0x28] sm:$0xff] }
   0xb   :  { %364 = vmatpush3.bf16.msra.mxu1 %v363_v30 }
   0xc   :  { %365 = vmatprep.subr.bf16.mxu1 %v414_v7 }
   0xd   :  { %341 = vmatpush3.bf16.msra.mxu0 %v340_v20 }
   0xe   :  { %343 = vmatprep.subr.bf16.mxu0 %v342_v21 }
   0xf   :  { %10 = vsyncpa [#allocation3], 0  ;;  %v348_v41 = vpack.c.bf16 %v32_v35, %v31_v34  ;;  %v350_v42 = vpack.c.bf16 %v50_v37, %v49_v36  ;;  %v33_v43 = vld [vmem:[%s625_s1 + $0x50] sm:$0xff]  ;;  %v34_v44 = vld [vmem:[%s625_s1 + $0x58] sm:$0xff]  ;;  %367 = vmatpush3.bf16.msra.mxu1 %v366_v38  ;;  %v369_v47 = vpack.c.bf16 %v138_v40, %v137_v39  ;;  %vm415_vm0 = vmmov 0  }
  0x10   :  { %v51_v45 = vld [vmem:[%s625_s1 + $0xe0] sm:$0xff]  ;;  %v52_v46 = vld [vmem:[%s625_s1 + $0xe8] sm:$0xff]  ;;  %368 = vmatprep.subr.bf16.mxu1 %v414_v7  ;;  %v139_v48 = vld [vmem:[%s627_s3 + $0x30] sm:$0xff]  ;;  %v352_v50 = vpack.c.bf16 %v34_v44, %v33_v43  ;;  %v416_v12 = vmov 0.0  }
  0x11   :  { %345 = vmatpush3.bf16.msra.mxu0 %v344_v29  ;;  %v140_v49 = vld [vmem:[%s627_s3 + $0x38] sm:$0xff]  ;;  %v354_v51 = vpack.c.bf16 %v52_v46, %v51_v45  ;;  %v35_v52 = vld [vmem:[%s625_s1 + $0x60] sm:$0xff]  ;;  %v36_v53 = vld [vmem:[%s625_s1 + $0x68] sm:$0xff]  ;;  %327 = vmatprep.mubr.msk.f32.mxu1 %vm415_vm0, %v416_v12 }
  0x12   :  { %347 = vmatprep.subr.bf16.mxu0 %v346_v33  ;;  %v53_v54 = vld [vmem:[%s625_s1 + $0xf0] sm:$0xff]  ;;  %v54_v55 = vld [vmem:[%s625_s1 + $0xf8] sm:$0xff]  ;;  %v372_v56 = vpack.c.bf16 %v140_v49, %v139_v48  ;;  %v141_v57 = vld [vmem:[%s627_s3 + $0x40] sm:$0xff]  ;;  %v356_v59 = vpack.c.bf16 %v36_v53, %v35_v52 }
  0x13   :  { %370 = vmatpush3.bf16.msra.mxu1 %v369_v47  ;;  %v142_v58 = vld [vmem:[%s627_s3 + $0x48] sm:$0xff]  ;;  %v358_v60 = vpack.c.bf16 %v54_v55, %v53_v54  ;;  %v37_v61 = vld [vmem:[%s625_s1 + $0x70] sm:$0xff]  ;;  %v38_v62 = vld [vmem:[%s625_s1 + $0x78] sm:$0xff] }
  0x14   :  { %371 = vmatprep.subr.bf16.mxu1 %v414_v7  ;;  %v375_v63 = vpack.c.bf16 %v142_v58, %v141_v57  ;;  %v143_v0 = vld [vmem:[%s627_s3 + $0x50] sm:$0xff]  ;;  %v144_v1 = vld [vmem:[%s627_s3 + $0x58] sm:$0xff]  ;;  %v360_v2 = vpack.c.bf16 %v38_v62, %v37_v61  ;;  %v21_v4 = vld [vmem:[%s624_s0] sm:$0xff] }
  0x15   :  { %349 = vmatpush3.bf16.msra.mxu0 %v348_v41  ;;  %v378_v3 = vpack.c.bf16 %v144_v1, %v143_v0  ;;  %v145_v5 = vld [vmem:[%s627_s3 + $0x60] sm:$0xff]  ;;  %v146_v6 = vld [vmem:[%s627_s3 + $0x68] sm:$0xff]  ;;  %v147_v9 = vld [vmem:[%s627_s3 + $0x70] sm:$0xff] }
  0x16   :  { %351 = vmatprep.subr.bf16.mxu0 %v350_v42  ;;  %v381_v8 = vpack.c.bf16 %v146_v6, %v145_v5  ;;  %v148_v10 = vld [vmem:[%s627_s3 + $0x78] sm:$0xff]  ;;  %v241_v14 = vld [vmem:[%s626_s2] ss:$0 sm:$0xff]  ;;  %s417_s3 = smov [#allocation2]  }
  0x17   :  { %373 = vmatpush3.bf16.msra.mxu1 %v372_v56  ;;  %v384_v11 = vpack.c.bf16 %v148_v10, %v147_v9  ;;  %v242_v18 = vld [vmem:[%s628_s4] ss:$0 sm:$0xff]  ;;  %s233_s20 = sshll.u32 %s417_s3, 4  ;;  %s234_s20 = int_to_ptr.vmem [resolvable:$true] %s233_s20 }
  0x18   :  { %374 = vmatprep.subr.bf16.mxu1 %v414_v7  ;;  %s390_s21 = scalar_lea.vmem %s234_s20, 128  ;;  %p395_p1 = scmp.lt.s32.totalorder %s234_s20, %s234_s20 }
  0x19   :  { %353 = vmatpush3.bf16.msra.mxu0 %v352_v50  ;;  %p391_p0 = scmp.ne.s32.totalorder %s234_s20, %s390_s21  ;;  %p396_p2 = scmp.lt.s32.totalorder %s390_s21, %s390_s21 }
  0x1a   :  { %355 = vmatprep.subr.bf16.mxu0 %v354_v51 }
  0x1b   :  { %376 = vmatpush3.bf16.msra.mxu1 %v375_v63  ;;  %p397_p3 = por %p396_p2, %p395_p1 }
  0x1c   :  { %377 = vmatprep.subr.bf16.mxu1 %v414_v7 }
  0x1d   :  { %357 = vmatpush3.bf16.msra.mxu0 %v356_v59  ;;  %p398_p4 = pnand %p397_p3, %p391_p0 }
  0x1e   :  { %359 = vmatprep.subr.bf16.mxu0 %v358_v60 }
  0x1f   :  { %379 = vmatpush3.bf16.msra.mxu1 %v378_v3 }
  0x20   :  { %380 = vmatprep.subr.bf16.mxu1 %v414_v7 }
  0x21   :  { %361 = vmatpush3.bf16.msra.mxu0 %v360_v2 }
  0x23   :  { %382 = vmatpush3.bf16.msra.mxu1 %v381_v8 }
  0x24   :  { %127 = vmatmul.mubr.f32.vlgmr.msra.gmra.mrb[0].mxu0 %v21_v4  ;;  %383 = vmatprep.subr.bf16.mxu1 %v414_v7 }
  0x27   :  { %385 = vmatpush3.bf16.msra.mxu1 %v384_v11 }
  0xf7   :  { %v275_v13 = vpop.f32.mrb[0].mxu0 }
  0xf8   :  { %v276_v15 = vpop.f32.mrb[1].mxu0 }
  0xf9   :  { %v277_v7 = vadd.f32 %v276_v15, %v275_v13 }
  0xfb   :  { %v129_v16 = vadd.f32 %v277_v7, %v241_v14 }
  0xfd   :  { %v132_v17 = vmax.f32 %v129_v16, 0.0 }
  0xff   :  { %328 = vmatmul.mubr.f32.vlgmr.msra.gmra.mrb[0].mxu1 %v132_v17 }
 0x1d2   :  { %v222_v19 = vpop.f32.mrb[0].mxu1 }
 0x1d3   :  { %v223_v20 = vadd.f32 %v242_v18, %v222_v19  ;;  %v329_v21 = vpop.f32.mrb[1].mxu1 }
 0x1d5   :  { %226 = vst [vmem:[#allocation2] sm:$0xff] %v223_v20 }
 0x1d6   :  { %401 = shalt.err (!%p398_p4)
}
 0x1d7   :  { %s402_s23 = scalar_lea.hbm %s629_s5, 128 }
 0x1d8   :  { %p403_p5 = scmp.ne.s32.totalorder %s629_s5, %s402_s23  ;;  %p406_p6 = scmp.lt.u32.totalorder %s402_s23, %s629_s5 }
 0x1da   :  { %p408_p7 = pnand %p406_p6, %p403_p5 }
 0x1dc   :  { %411 = shalt.err (!%p408_p7)
}
 0x1dd   :  { %236 = dma.vmem_to_hbm [thread:$0]  %s234_s20, 128, %s629_s5, [#allocation3]  }
 0x1de   :  { %412 = dma.done.wait [#allocation3], 128  }
 0x1df   :  { %413 = vsyncadd [#allocation3], 4294967168 }
 0x1e0   :  { %240 = vsyncpa [#allocation3], 1 }

</bundles_post_ra>
